<compile_context>
chip_gen: v7x
topology: tpu7x:2x2x1
jax: 0.10.0
libtpu: 0.0.40
codegen_flags: <defaults>
</compile_context>

<pallas_src>
import jax
import jax.numpy as jnp
import numpy as np
from jax.experimental import pallas as pl
from jax.experimental.pallas import tpu as pltpu

M_LATENT = 8           # latent dim
HIDDEN = 128           # hidden width of the decoder MLP
IMG = 28               # output image side (fixed by log_var shape)
OUT = IMG * IMG        # 784 = 6*128 + 16 -> lane-native store width
TB_MAX = 1024          # max batch tile (double-buffered f32 out ~ 6.3 MiB)


def _decoder_kernel(z_ref, w1_ref, b1_ref, w2_ref, b2_ref, w3_ref, b3_ref,
                    mean_ref):
    """One batch tile: 3 MXU matmuls (bf16 in, f32 acc) + VPU bias/ReLU."""
    # Params live in HBM/VMEM as f32 (PyTorch parity); cast to bf16 at the MXU.
    z = z_ref[...].astype(jnp.bfloat16)                               # (TB, M)
    h1 = jnp.dot(z, w1_ref[...].astype(jnp.bfloat16),
                 preferred_element_type=jnp.float32)
    h1 = jnp.maximum(h1 + b1_ref[...], 0.0)                           # (TB, H) f32
    h2 = jnp.dot(h1.astype(jnp.bfloat16), w2_ref[...].astype(jnp.bfloat16),
                 preferred_element_type=jnp.float32)
    h2 = jnp.maximum(h2 + b2_ref[...], 0.0)                           # (TB, H) f32
    mean = jnp.dot(h2.astype(jnp.bfloat16), w3_ref[...].astype(jnp.bfloat16),
                   preferred_element_type=jnp.float32)
    mean_ref[...] = mean + b3_ref[...]                                # (TB, 784)
    # TODO(synk): td.Independent(td.Normal(...), 2) is a distribution object,
    # not a tensor; the kernel emits its `mean` parameter only.


def _tiling(batch):
    """Pick (tile, padded_batch).

    Big tiles amortize per-step overhead; >=2 grid steps when B >= 16 so the
    'parallel' axis can shard across both v7x TensorCores; tiny batches are
    only padded to a sublane multiple (8), not to 128.
    """
    b8 = ((batch + 7) // 8) * 8                 # sublane multiple
    steps = max(1, pl.cdiv(b8, TB_MAX))
    if steps == 1 and b8 >= 16:
        steps = 2
    tile = ((pl.cdiv(b8, steps) + 7) // 8) * 8
    steps = pl.cdiv(b8, tile)
    return tile, steps * tile


@jax.jit
def gaussian_decoder_forward(z, params):
    """Returns (mean (B,28,28), scale (28,28)) — the Normal's parameters."""
    w1, b1, w2, b2, w3, b3, log_var = params
    B = z.shape[0]
    TB, B_pad = _tiling(B)
    if B_pad != B:
        z = jnp.pad(z, ((0, B_pad - B), (0, 0)))

    flops = 2 * B_pad * (M_LATENT * HIDDEN + HIDDEN * HIDDEN + HIDDEN * OUT)
    bytes_accessed = (
        B_pad * M_LATENT * 4 + B_pad * OUT * 4
        + (M_LATENT * HIDDEN + HIDDEN
           + HIDDEN * HIDDEN + HIDDEN
           + HIDDEN * OUT + OUT) * 4)

    mean_flat = pl.pallas_call(
        _decoder_kernel,
        out_shape=jax.ShapeDtypeStruct((B_pad, OUT), jnp.float32),
        grid_spec=pltpu.PrefetchScalarGridSpec(
            num_scalar_prefetch=0,
            grid=(B_pad // TB,),
            in_specs=[
                pl.BlockSpec((TB, M_LATENT), lambda i: (i, 0)),      # z tile
                pl.BlockSpec((M_LATENT, HIDDEN), lambda i: (0, 0)),  # w1 (resident)
                pl.BlockSpec((1, HIDDEN), lambda i: (0, 0)),         # b1
                pl.BlockSpec((HIDDEN, HIDDEN), lambda i: (0, 0)),    # w2
                pl.BlockSpec((1, HIDDEN), lambda i: (0, 0)),         # b2
                pl.BlockSpec((HIDDEN, OUT), lambda i: (0, 0)),       # w3
                pl.BlockSpec((1, OUT), lambda i: (0, 0)),            # b3
            ],
            out_specs=pl.BlockSpec((TB, OUT), lambda i: (i, 0)),
        ),
        compiler_params=pltpu.CompilerParams(
            dimension_semantics=("parallel",)),
        cost_estimate=pl.CostEstimate(
            flops=flops, transcendentals=0, bytes_accessed=bytes_accessed),
    )(z, w1, b1, w2, b2, w3, b3)

    if B_pad != B:
        mean_flat = mean_flat[:B]
    mean = mean_flat.reshape(B, IMG, IMG)      # free bitcast when B_pad == B
    scale = jnp.exp(0.5 * log_var)             # hoisted: independent of z
    return mean, scale


def independent_normal_log_prob(x, mean, scale):
    """Plain-JAX glue: log_prob of td.Independent(td.Normal(mean, scale), 2)."""
    var = scale ** 2
    ll = -0.5 * (jnp.log(2.0 * jnp.pi * var) + (x - mean) ** 2 / var)
    return ll.sum(axis=(-1, -2))


def init_params(key):
    k1, k2, k3 = jax.random.split(key, 3)

    def linear_init(k, fan_in, fan_out):
        bound = 1.0 / np.sqrt(fan_in)
        kw, kb = jax.random.split(k)
        w = jax.random.uniform(kw, (fan_in, fan_out), jnp.float32, -bound, bound)
        b = jax.random.uniform(kb, (1, fan_out), jnp.float32, -bound, bound)
        return w, b

    w1, b1 = linear_init(k1, M_LATENT, HIDDEN)
    w2, b2 = linear_init(k2, HIDDEN, HIDDEN)
    w3, b3 = linear_init(k3, HIDDEN, OUT)
    log_var = jnp.zeros((IMG, IMG), jnp.float32)   # nn.Parameter(torch.zeros(28,28))
    # Weights kept f32 (parity with the f32 PyTorch module); the kernel casts
    # them to bf16 at the MXU inputs.
    return (w1, b1, w2, b2, w3, b3, log_var)


def _reference_forward(z, params):
    """Pure-JAX reference using the same bf16-input / f32-accumulate math."""
    w1, b1, w2, b2, w3, b3, log_var = params

    def mm(a, w):
        return jnp.dot(a.astype(jnp.bfloat16), w.astype(jnp.bfloat16),
                       preferred_element_type=jnp.float32)

    h1 = jnp.maximum(mm(z, w1) + b1, 0.0)
    h2 = jnp.maximum(mm(h1, w2) + b2, 0.0)
    mean = mm(h2, w3) + b3
    return mean.reshape(z.shape[0], IMG, IMG), jnp.exp(0.5 * log_var)


if __name__ == "__main__":
    key = jax.random.PRNGKey(0)
    kz, kp = jax.random.split(key)
    params = init_params(kp)

    # Small inference-sized batch (pads only to 8 rows, single grid step).
    B = 2
    z = jax.random.normal(kz, (B, M_LATENT), jnp.float32)
    mean, scale = gaussian_decoder_forward(z, params)
    jax.block_until_ready((mean, scale))

    mean_ref, scale_ref = _reference_forward(z, params)
    np.testing.assert_allclose(np.asarray(mean), np.asarray(mean_ref),
                               rtol=1e-3, atol=1e-3)
    np.testing.assert_allclose(np.asarray(scale), np.asarray(scale_ref),
                               rtol=1e-6, atol=1e-6)

    # Exercise the Independent(Normal, 2) log_prob glue once.
    lp = independent_normal_log_prob(mean_ref, mean, scale)
    jax.block_until_ready(lp)
    assert lp.shape == (B,)

    # Multi-tile batch to cover the grid (>=2 steps) path.
    B2 = 300
    z2 = jax.random.normal(kz, (B2, M_LATENT), jnp.float32)
    mean2, _ = gaussian_decoder_forward(z2, params)
    jax.block_until_ready(mean2)
    mean2_ref, _ = _reference_forward(z2, params)
    np.testing.assert_allclose(np.asarray(mean2), np.asarray(mean2_ref),
                               rtol=1e-3, atol=1e-3)

    print("KERNEL_OK")
</pallas_src>

<mosaic_0001>
module attributes {stable_mosaic.version = 11 : i64} {
  func.func @_decoder_kernel(%arg0: i32, %arg1: memref<8x8xf32, #tpu.memory_space<vmem>>, %arg2: memref<8x128xf32, #tpu.memory_space<vmem>>, %arg3: memref<1x128xf32, #tpu.memory_space<vmem>>, %arg4: memref<128x128xf32, #tpu.memory_space<vmem>>, %arg5: memref<1x128xf32, #tpu.memory_space<vmem>>, %arg6: memref<128x784xf32, #tpu.memory_space<vmem>>, %arg7: memref<1x784xf32, #tpu.memory_space<vmem>>, %arg8: memref<8x784xf32, #tpu.memory_space<vmem>>) attributes {dimension_semantics = [#tpu.dimension_semantics<parallel>], iteration_bounds = array<i64: 1>, scalar_prefetch = 0 : i64, scratch_operands = 0 : i64, tpu.core_type = #tpu.core_type<tc>, window_params = [{transform_indices = @transform_0, window_bounds = array<i64: 8, 8>}, {pipeline_mode = #tpu.pipeline_mode<synchronous>, transform_indices = @transform_1, window_bounds = array<i64: 8, 128>}, {pipeline_mode = #tpu.pipeline_mode<synchronous>, transform_indices = @transform_2, window_bounds = array<i64: 1, 128>}, {pipeline_mode = #tpu.pipeline_mode<synchronous>, transform_indices = @transform_3, window_bounds = array<i64: 128, 128>}, {pipeline_mode = #tpu.pipeline_mode<synchronous>, transform_indices = @transform_4, window_bounds = array<i64: 1, 128>}, {pipeline_mode = #tpu.pipeline_mode<synchronous>, transform_indices = @transform_5, window_bounds = array<i64: 128, 784>}, {pipeline_mode = #tpu.pipeline_mode<synchronous>, transform_indices = @transform_6, window_bounds = array<i64: 1, 784>}, {transform_indices = @transform_7, window_bounds = array<i64: 8, 784>}]} {
    %c0 = arith.constant 0 : index
    %c0_0 = arith.constant 0 : index
    %0 = vector.load %arg1[%c0, %c0_0] : memref<8x8xf32, #tpu.memory_space<vmem>>, vector<8x8xf32>
    %1 = arith.truncf %0 : vector<8x8xf32> to vector<8x8xbf16>
    %c0_1 = arith.constant 0 : index
    %c0_2 = arith.constant 0 : index
    %2 = vector.load %arg2[%c0_1, %c0_2] : memref<8x128xf32, #tpu.memory_space<vmem>>, vector<8x128xf32>
    %3 = arith.truncf %2 : vector<8x128xf32> to vector<8x128xbf16>
    %cst = arith.constant dense<0.000000e+00> : vector<8x128xf32>
    %4 = tpu.matmul %1, %3, %cst {dimension_numbers = #tpu.dot_dimension_numbers<[1], [0], [0], [1], [0, 0, 1, 1], [], []>} : vector<8x8xbf16>, vector<8x128xbf16>, vector<8x128xf32> -> vector<8x128xf32>
    %c0_3 = arith.constant 0 : index
    %c0_4 = arith.constant 0 : index
    %5 = vector.load %arg3[%c0_3, %c0_4] : memref<1x128xf32, #tpu.memory_space<vmem>>, vector<1x128xf32>
    %6 = vector.broadcast %5 : vector<1x128xf32> to vector<8x128xf32>
    %7 = arith.addf %4, %6 : vector<8x128xf32>
    %cst_5 = arith.constant 0.000000e+00 : f32
    %8 = vector.broadcast %cst_5 : f32 to vector<8x128xf32>
    %9 = arith.maximumf %7, %8 : vector<8x128xf32>
    %10 = arith.truncf %9 : vector<8x128xf32> to vector<8x128xbf16>
    %c0_6 = arith.constant 0 : index
    %c0_7 = arith.constant 0 : index
    %11 = vector.load %arg4[%c0_6, %c0_7] : memref<128x128xf32, #tpu.memory_space<vmem>>, vector<128x128xf32>
    %12 = arith.truncf %11 : vector<128x128xf32> to vector<128x128xbf16>
    %cst_8 = arith.constant dense<0.000000e+00> : vector<8x128xf32>
    %13 = tpu.matmul %10, %12, %cst_8 {dimension_numbers = #tpu.dot_dimension_numbers<[1], [0], [0], [1], [0, 0, 1, 1], [], []>} : vector<8x128xbf16>, vector<128x128xbf16>, vector<8x128xf32> -> vector<8x128xf32>
    %c0_9 = arith.constant 0 : index
    %c0_10 = arith.constant 0 : index
    %14 = vector.load %arg5[%c0_9, %c0_10] : memref<1x128xf32, #tpu.memory_space<vmem>>, vector<1x128xf32>
    %15 = vector.broadcast %14 : vector<1x128xf32> to vector<8x128xf32>
    %16 = arith.addf %13, %15 : vector<8x128xf32>
    %cst_11 = arith.constant 0.000000e+00 : f32
    %17 = vector.broadcast %cst_11 : f32 to vector<8x128xf32>
    %18 = arith.maximumf %16, %17 : vector<8x128xf32>
    %19 = arith.truncf %18 : vector<8x128xf32> to vector<8x128xbf16>
    %c0_12 = arith.constant 0 : index
    %c0_13 = arith.constant 0 : index
    %20 = vector.load %arg6[%c0_12, %c0_13] : memref<128x784xf32, #tpu.memory_space<vmem>>, vector<128x784xf32>
    %21 = arith.truncf %20 : vector<128x784xf32> to vector<128x784xbf16>
    %cst_14 = arith.constant dense<0.000000e+00> : vector<8x784xf32>
    %22 = tpu.matmul %19, %21, %cst_14 {dimension_numbers = #tpu.dot_dimension_numbers<[1], [0], [0], [1], [0, 0, 1, 1], [], []>} : vector<8x128xbf16>, vector<128x784xbf16>, vector<8x784xf32> -> vector<8x784xf32>
    %c0_15 = arith.constant 0 : index
    %c0_16 = arith.constant 0 : index
    %23 = vector.load %arg7[%c0_15, %c0_16] : memref<1x784xf32, #tpu.memory_space<vmem>>, vector<1x784xf32>
    %24 = vector.broadcast %23 : vector<1x784xf32> to vector<8x784xf32>
    %25 = arith.addf %22, %24 : vector<8x784xf32>
    %c0_17 = arith.constant 0 : index
    %c0_18 = arith.constant 0 : index
    %26 = vector.load %arg8[%c0_17, %c0_18] : memref<8x784xf32, #tpu.memory_space<vmem>>, vector<8x784xf32>
    tpu.vector_store %arg8[%c0_17, %c0_18], %25 {strides = array<i32>} : memref<8x784xf32, #tpu.memory_space<vmem>>, vector<8x784xf32>,
    return
  }
  func.func @transform_0(%arg0: i32) -> (i32, i32) {
    %c0_i32 = arith.constant 0 : i32
    %c0_i32_0 = arith.constant 0 : i32
    return %arg0, %c0_i32 : i32, i32
  }
  func.func @transform_1(%arg0: i32) -> (i32, i32) {
    %c0_i32 = arith.constant 0 : i32
    %c0_i32_0 = arith.constant 0 : i32
    %c0_i32_1 = arith.constant 0 : i32
    return %c0_i32, %c0_i32_0 : i32, i32
  }
  func.func @transform_2(%arg0: i32) -> (i32, i32) {
    %c0_i32 = arith.constant 0 : i32
    %c0_i32_0 = arith.constant 0 : i32
    %c0_i32_1 = arith.constant 0 : i32
    return %c0_i32, %c0_i32_0 : i32, i32
  }
  func.func @transform_3(%arg0: i32) -> (i32, i32) {
    %c0_i32 = arith.constant 0 : i32
    %c0_i32_0 = arith.constant 0 : i32
    %c0_i32_1 = arith.constant 0 : i32
    return %c0_i32, %c0_i32_0 : i32, i32
  }
  func.func @transform_4(%arg0: i32) -> (i32, i32) {
    %c0_i32 = arith.constant 0 : i32
    %c0_i32_0 = arith.constant 0 : i32
    %c0_i32_1 = arith.constant 0 : i32
    return %c0_i32, %c0_i32_0 : i32, i32
  }
  func.func @transform_5(%arg0: i32) -> (i32, i32) {
    %c0_i32 = arith.constant 0 : i32
    %c0_i32_0 = arith.constant 0 : i32
    %c0_i32_1 = arith.constant 0 : i32
    return %c0_i32, %c0_i32_0 : i32, i32
  }
  func.func @transform_6(%arg0: i32) -> (i32, i32) {
    %c0_i32 = arith.constant 0 : i32
    %c0_i32_0 = arith.constant 0 : i32
    %c0_i32_1 = arith.constant 0 : i32
    return %c0_i32, %c0_i32_0 : i32, i32
  }
  func.func @transform_7(%arg0: i32) -> (i32, i32) {
    %c0_i32 = arith.constant 0 : i32
    %c0_i32_0 = arith.constant 0 : i32
    return %arg0, %c0_i32 : i32, i32
  }
}

</mosaic_0001>

<bundles_post_ra>
// kernel: gaussian_decoder_forward.1
= control target key start
LH: loop header
LB: loop body
LE: loop exit
PB: predicated region body
PF: predicated region fallthrough
CT: control target
= control target key end

     0   :  { %v613_v0 = vmov 0.0   ;;  %vm42_vm0 = vcmask 1043456   ;;  %vm614_vm1 = vmmov 0   ;;  %vm38_vm2 = vcmask 64512   ;;  %s1105_s1 = inlined_call_operand.vmem [shape: f32[8,128], index: 1, kind: input, shape index: {}]   ;;  %s1106_s0 = inlined_call_operand.vmem [shape: f32[8,8], index: 0, kind: input, shape index: {}]   ;;  %s1107_s3 = inlined_call_operand.vmem [shape: f32[128,128], index: 3, kind: input, shape index: {}]   ;;  %s1108_s5 = inlined_call_operand.vmem [shape: f32[128,784], index: 5, kind: input, shape index: {}]   ;;  %s1109_s2 = inlined_call_operand.vmem [shape: f32[1,128], index: 2, kind: input, shape index: {}]   ;;  %s1110_s4 = inlined_call_operand.vmem [shape: f32[1,128], index: 4, kind: input, shape index: {}]   ;;  %s1111_s6 = inlined_call_operand.vmem [shape: f32[1,784], index: 6, kind: input, shape index: {}]   ;;  %s1112_s7 = inlined_call_operand.vmem [shape: f32[8,784], index: 7, kind: output, shape index: {}]  }
   0x1   :  { %564 = vmatprep.subr.bf16.mxu0 %v613_v0  ;;  %v29_v1 = vld [vmem:[%s1105_s1] sm:$0xff]  ;;  %566 = vmatprep.mubr.msk.bf16.mxu0 %vm614_vm1, %v613_v0  ;;  %v89_v5 = vld [vmem:[%s1107_s3 + $0x8] sm:$0xff]  ;;  %v90_v6 = vld [vmem:[%s1107_s3 + $0x10] sm:$0xff]  ;;  %vm535_vm3 = vcmask 130048  }
   0x2   :  { %v27_v2 = vld [vmem:[%s1106_s0] sm:$0xff]  ;;  %v30_v4 = vpack.c.bf16 %v29_v1, %v29_v1  ;;  %570 = vmatprep.subr.bf16.mxu1 %v613_v0  ;;  %v91_v7 = vld [vmem:[%s1107_s3 + $0x18] sm:$0xff]  ;;  %586 = vmatprep.mubr.msk.bf16.mxu1 %vm614_vm1, %v613_v0  ;;  %v93_v13 = vld [vmem:[%s1107_s3 + $0x28] sm:$0xff] }
   0x3   :  { %v88_v3 = vld [vmem:[%s1107_s3] sm:$0xff]  ;;  %v28_v10 = vpack.c.bf16 %v27_v2, %v27_v2  ;;  %v105_v11 = vpack.c.bf16 %v91_v7, %v90_v6  ;;  %v94_v15 = vld [vmem:[%s1107_s3 + $0x30] sm:$0xff]  ;;  %v95_v16 = vld [vmem:[%s1107_s3 + $0x38] sm:$0xff] }
   0x4   :  { %v104_v8 = vpack.c.bf16 %v89_v5, %v88_v3  ;;  %v44_v9 = vsel %vm42_vm0, %v30_v4, 0  ;;  %v92_v12 = vld [vmem:[%s1107_s3 + $0x20] sm:$0xff]  ;;  %v107_v17 = vpack.c.bf16 %v95_v16, %v94_v15  ;;  %v97_v19 = vld [vmem:[%s1107_s3 + $0x48] sm:$0xff]  ;;  %v98_v21 = vld [vmem:[%s1107_s3 + $0x50] sm:$0xff] }
   0x5   :  { %565 = vmatpush3.bf16.msra.mxu0 %v44_v9  ;;  %v106_v14 = vpack.c.bf16 %v93_v13, %v92_v12  ;;  %v96_v18 = vld [vmem:[%s1107_s3 + $0x40] sm:$0xff]  ;;  %v99_v22 = vld [vmem:[%s1107_s3 + $0x58] sm:$0xff]  ;;  %v101_v25 = vld [vmem:[%s1107_s3 + $0x68] sm:$0xff] }
   0x6   :  { %571 = vmatpush3.bf16.msra.mxu1 %v104_v8  ;;  %v108_v20 = vpack.c.bf16 %v97_v19, %v96_v18  ;;  %v109_v23 = vpack.c.bf16 %v99_v22, %v98_v21  ;;  %v100_v24 = vld [vmem:[%s1107_s3 + $0x60] sm:$0xff]  ;;  %v102_v27 = vld [vmem:[%s1107_s3 + $0x70] sm:$0xff]  ;;  %v103_v28 = vld [vmem:[%s1107_s3 + $0x78] sm:$0xff] }
   0x7   :  { %572 = vmatprep.subr.bf16.mxu1 %v613_v0  ;;  %v110_v26 = vpack.c.bf16 %v101_v25, %v100_v24  ;;  %v111_v29 = vpack.c.bf16 %v103_v28, %v102_v27  ;;  %v162_v30 = vld [vmem:[%s1108_s5 + $0x8] sm:$0xff]  ;;  %v169_v31 = vld [vmem:[%s1108_s5 + $0x40] sm:$0xff]  ;;  %v164_v32 = vld [vmem:[%s1108_s5 + $0x18] sm:$0xff] }
   0x8   :  { %567 = vmatmul.mubr.msk.bf16.vlgmr.msra.gmra.mrb[0].mxu0 %vm38_vm2, %v28_v10  ;;  %v274_v33 = vpack.c.bf16 %v169_v31, %v162_v30  ;;  %v171_v34 = vld [vmem:[%s1108_s5 + $0x50] sm:$0xff]  ;;  %v161_v35 = vld [vmem:[%s1108_s5] sm:$0xff]  ;;  %v168_v36 = vld [vmem:[%s1108_s5 + $0x38] sm:$0xff] }
   0x9   :  { %v276_v37 = vpack.c.bf16 %v171_v34, %v164_v32  ;;  %v273_v38 = vpack.c.bf16 %v168_v36, %v161_v35  ;;  %v176_v39 = vld [vmem:[%s1108_s5 + $0x78] sm:$0xff]  ;;  %v183_v40 = vld [vmem:[%s1108_s5 + $0xb0] sm:$0xff]  ;;  %v182_v43 = vld [vmem:[%s1108_s5 + $0xa8] sm:$0xff] }
   0xa   :  { %573 = vmatpush3.bf16.msra.mxu1 %v105_v11  ;;  %366 = vmatprep.subr.bf16.mxu0 %v274_v33  ;;  %v281_v41 = vpack.c.bf16 %v183_v40, %v176_v39  ;;  %v175_v42 = vld [vmem:[%s1108_s5 + $0x70] sm:$0xff]  ;;  %v190_v45 = vld [vmem:[%s1108_s5 + $0xe8] sm:$0xff]  ;;  %v197_v46 = vld [vmem:[%s1108_s5 + $0x120] sm:$0xff] }
   0xb   :  { %574 = vmatprep.subr.bf16.mxu1 %v613_v0  ;;  %367 = vmatpush1.bf16.msra.mxu0 %v273_v38  ;;  %v280_v44 = vpack.c.bf16 %v182_v43, %v175_v42  ;;  %v288_v47 = vpack.c.bf16 %v197_v46, %v190_v45  ;;  %v189_v48 = vld [vmem:[%s1108_s5 + $0xe0] sm:$0xff]  ;;  %v196_v49 = vld [vmem:[%s1108_s5 + $0x118] sm:$0xff]  ;;  %v211_v52 = vld [vmem:[%s1108_s5 + $0x190] sm:$0xff] }
   0xc   :  { %368 = vmatprep.subr.bf16.mxu0 %v281_v41  ;;  %v287_v50 = vpack.c.bf16 %v196_v49, %v189_v48  ;;  %v204_v51 = vld [vmem:[%s1108_s5 + $0x158] sm:$0xff]  ;;  %v203_v54 = vld [vmem:[%s1108_s5 + $0x150] sm:$0xff]  ;;  %v210_v55 = vld [vmem:[%s1108_s5 + $0x188] sm:$0xff] }
   0xd   :  { %v295_v53 = vpack.c.bf16 %v211_v52, %v204_v51  ;;  %v294_v56 = vpack.c.bf16 %v210_v55, %v203_v54  ;;  %v218_v57 = vld [vmem:[%s1108_s5 + $0x1c8] sm:$0xff]  ;;  %v225_v58 = vld [vmem:[%s1108_s5 + $0x200] sm:$0xff]  ;;  %v224_v61 = vld [vmem:[%s1108_s5 + $0x1f8] sm:$0xff] }
   0xe   :  { %575 = vmatpush3.bf16.msra.mxu1 %v106_v14  ;;  %v302_v59 = vpack.c.bf16 %v225_v58, %v218_v57  ;;  %v217_v60 = vld [vmem:[%s1108_s5 + $0x1c0] sm:$0xff]  ;;  %v232_v63 = vld [vmem:[%s1108_s5 + $0x238] sm:$0xff]  ;;  %v239_v1 = vld [vmem:[%s1108_s5 + $0x270] sm:$0xff] }
   0xf   :  { %576 = vmatprep.subr.bf16.mxu1 %v613_v0  ;;  %369 = vmatpush1.bf16.msra.mxu0 %v280_v44  ;;  %v301_v62 = vpack.c.bf16 %v224_v61, %v217_v60  ;;  %v309_v2 = vpack.c.bf16 %v239_v1, %v232_v63  ;;  %v231_v3 = vld [vmem:[%s1108_s5 + $0x230] sm:$0xff]  ;;  %v238_v4 = vld [vmem:[%s1108_s5 + $0x268] sm:$0xff]  ;;  %v253_v7 = vld [vmem:[%s1108_s5 + $0x2e0] sm:$0xff] }
  0x10   :  { %370 = vmatprep.subr.bf16.mxu0 %v288_v47  ;;  %v308_v5 = vpack.c.bf16 %v238_v4, %v231_v3  ;;  %v246_v6 = vld [vmem:[%s1108_s5 + $0x2a8] sm:$0xff]  ;;  %v245_v9 = vld [vmem:[%s1108_s5 + $0x2a0] sm:$0xff]  ;;  %v252_v10 = vld [vmem:[%s1108_s5 + $0x2d8] sm:$0xff] }
  0x11   :  { %v316_v8 = vpack.c.bf16 %v253_v7, %v246_v6  ;;  %v315_v11 = vpack.c.bf16 %v252_v10, %v245_v9  ;;  %v541_v12 = vld [vmem:[%s1109_s2] ss:$0 sm:$0xff]  ;;  %v163_v16 = vld [vmem:[%s1108_s5 + $0x10] sm:$0xff]  ;;  %v178_v19 = vld [vmem:[%s1108_s5 + $0x88] sm:$0xff] }
  0x12   :  { %577 = vmatpush3.bf16.msra.mxu1 %v107_v17  ;;  %v170_v17 = vld [vmem:[%s1108_s5 + $0x48] sm:$0xff]  ;;  %v184_v27 = vld [vmem:[%s1108_s5 + $0xb8] sm:$0xff]  ;;  %v191_v32 = vld [vmem:[%s1108_s5 + $0xf0] sm:$0xff] }
  0x13   :  { %578 = vmatprep.subr.bf16.mxu1 %v613_v0  ;;  %371 = vmatpush1.bf16.msra.mxu0 %v287_v50  ;;  %v192_v28 = vld [vmem:[%s1108_s5 + $0xf8] sm:$0xff]  ;;  %v198_v33 = vld [vmem:[%s1108_s5 + $0x128] sm:$0xff]  ;;  %v213_v35 = vld [vmem:[%s1108_s5 + $0x1a0] sm:$0xff] }
  0x14   :  { %372 = vmatprep.subr.bf16.mxu0 %v295_v53  ;;  %v206_v34 = vld [vmem:[%s1108_s5 + $0x168] sm:$0xff]  ;;  %v289_v36 = vpack.c.bf16 %v198_v33, %v191_v32  ;;  %v205_v38 = vld [vmem:[%s1108_s5 + $0x160] sm:$0xff]  ;;  %v212_v39 = vld [vmem:[%s1108_s5 + $0x198] sm:$0xff] }
  0x15   :  { %v220_v40 = vld [vmem:[%s1108_s5 + $0x1d8] sm:$0xff]  ;;  %v227_v41 = vld [vmem:[%s1108_s5 + $0x210] sm:$0xff]  ;;  %v296_v42 = vpack.c.bf16 %v212_v39, %v205_v38  ;;  %v226_v45 = vld [vmem:[%s1108_s5 + $0x208] sm:$0xff] }
  0x16   :  { %579 = vmatpush3.bf16.msra.mxu1 %v108_v20  ;;  %v185_v20 = vld [vmem:[%s1108_s5 + $0xc0] sm:$0xff]  ;;  %v304_v43 = vpack.c.bf16 %v227_v41, %v220_v40  ;;  %v219_v44 = vld [vmem:[%s1108_s5 + $0x1d0] sm:$0xff]  ;;  %v234_v46 = vld [vmem:[%s1108_s5 + $0x248] sm:$0xff] }
  0x17   :  { %580 = vmatprep.subr.bf16.mxu1 %v613_v0  ;;  %373 = vmatpush1.bf16.msra.mxu0 %v294_v56  ;;  %v283_v25 = vpack.c.bf16 %v185_v20, %v178_v19  ;;  %v241_v47 = vld [vmem:[%s1108_s5 + $0x280] sm:$0xff]  ;;  %v303_v48 = vpack.c.bf16 %v226_v45, %v219_v44  ;;  %v240_v51 = vld [vmem:[%s1108_s5 + $0x278] sm:$0xff]  ;;  %v255_v53 = vld [vmem:[%s1108_s5 + $0x2f0] sm:$0xff] }
  0x18   :  { %374 = vmatprep.subr.bf16.mxu0 %v302_v59  ;;  %v311_v49 = vpack.c.bf16 %v241_v47, %v234_v46  ;;  %v233_v50 = vld [vmem:[%s1108_s5 + $0x240] sm:$0xff]  ;;  %v248_v52 = vld [vmem:[%s1108_s5 + $0x2b8] sm:$0xff]  ;;  %v247_v56 = vld [vmem:[%s1108_s5 + $0x2b0] sm:$0xff] }
  0x19   :  { %v310_v54 = vpack.c.bf16 %v240_v51, %v233_v50  ;;  %v318_v55 = vpack.c.bf16 %v255_v53, %v248_v52  ;;  %v254_v57 = vld [vmem:[%s1108_s5 + $0x2e8] sm:$0xff]  ;;  %v260_v59 = vld [vmem:[%s1108_s5 + $0x318] sm:$0xff]  ;;  %v267_v60 = vld [vmem:[%s1108_s5 + $0x350] sm:$0xff] }
  0x1a   :  { %581 = vmatpush3.bf16.msra.mxu1 %v109_v23  ;;  %v275_v23 = vpack.c.bf16 %v170_v17, %v163_v16  ;;  %v317_v58 = vpack.c.bf16 %v254_v57, %v247_v56  ;;  %v262_v61 = vld [vmem:[%s1108_s5 + $0x328] sm:$0xff]  ;;  %v269_v63 = vld [vmem:[%s1108_s5 + $0x360] sm:$0xff]  ;;  %v259_v1 = vld [vmem:[%s1108_s5 + $0x310] sm:$0xff] }
  0x1b   :  { %582 = vmatprep.subr.bf16.mxu1 %v613_v0  ;;  %375 = vmatpush1.bf16.msra.mxu0 %v301_v62  ;;  %v323_v62 = vpack.c.bf16 %v267_v60, %v260_v59  ;;  %v325_v3 = vpack.c.bf16 %v269_v63, %v262_v61  ;;  %v268_v6 = vld [vmem:[%s1108_s5 + $0x358] sm:$0xff]  ;;  %v173_v9 = vld [vmem:[%s1108_s5 + $0x60] sm:$0xff]  ;;  %v174_v19 = vld [vmem:[%s1108_s5 + $0x68] sm:$0xff] }
  0x1c   :  { %376 = vmatprep.subr.bf16.mxu0 %v309_v2  ;;  %v266_v2 = vld [vmem:[%s1108_s5 + $0x348] sm:$0xff]  ;;  %v172_v17 = vld [vmem:[%s1108_s5 + $0x58] sm:$0xff]  ;;  %v195_v40 = vld [vmem:[%s1108_s5 + $0x110] sm:$0xff] }
  0x1d   :  { %v322_v4 = vpack.c.bf16 %v266_v2, %v259_v1  ;;  %v188_v32 = vld [vmem:[%s1108_s5 + $0xd8] sm:$0xff]  ;;  %v194_v33 = vld [vmem:[%s1108_s5 + $0x108] sm:$0xff]  ;;  %v207_v46 = vld [vmem:[%s1108_s5 + $0x170] sm:$0xff] }
  0x1e   :  { %583 = vmatpush3.bf16.msra.mxu1 %v110_v26  ;;  %v177_v26 = vld [vmem:[%s1108_s5 + $0x80] sm:$0xff]  ;;  %v200_v39 = vld [vmem:[%s1108_s5 + $0x138] sm:$0xff]  ;;  %v202_v41 = vld [vmem:[%s1108_s5 + $0x148] sm:$0xff] }
  0x1f   :  { %584 = vmatprep.subr.bf16.mxu1 %v613_v0  ;;  %377 = vmatpush1.bf16.msra.mxu0 %v308_v5  ;;  %v282_v30 = vpack.c.bf16 %v184_v27, %v177_v26  ;;  %v261_v5 = vld [vmem:[%s1108_s5 + $0x320] sm:$0xff]  ;;  %v179_v27 = vld [vmem:[%s1108_s5 + $0x90] sm:$0xff]  ;;  %v293_v45 = vpack.c.bf16 %v202_v41, %v195_v40  ;;  %v216_v50 = vld [vmem:[%s1108_s5 + $0x1b8] sm:$0xff] }
  0x20   :  { %378 = vmatprep.subr.bf16.mxu0 %v316_v8  ;;  %v324_v7 = vpack.c.bf16 %v268_v6, %v261_v5  ;;  %v166_v8 = vld [vmem:[%s1108_s5 + $0x28] sm:$0xff]  ;;  %v229_v52 = vld [vmem:[%s1108_s5 + $0x220] sm:$0xff]  ;;  %v228_v57 = vld [vmem:[%s1108_s5 + $0x218] sm:$0xff] }
  0x21   :  { %v278_v10 = vpack.c.bf16 %v173_v9, %v166_v8  ;;  %v222_v51 = vld [vmem:[%s1108_s5 + $0x1e8] sm:$0xff]  ;;  %v236_v60 = vld [vmem:[%s1108_s5 + $0x258] sm:$0xff]  ;;  %v243_v61 = vld [vmem:[%s1108_s5 + $0x290] sm:$0xff] }
  0x22   :  { %585 = vmatpush3.bf16.msra.mxu1 %v111_v29  ;;  %v199_v29 = vld [vmem:[%s1108_s5 + $0x130] sm:$0xff]  ;;  %v306_v56 = vpack.c.bf16 %v229_v52, %v222_v51  ;;  %v230_v59 = vld [vmem:[%s1108_s5 + $0x228] sm:$0xff]  ;;  %v313_v2 = vpack.c.bf16 %v243_v61, %v236_v60  ;;  %v244_v5 = vld [vmem:[%s1108_s5 + $0x298] sm:$0xff] }
  0x23   :  { %407 = vmatprep.subr.bf16.mxu1 %v276_v37  ;;  %379 = vmatpush1.bf16.msra.mxu0 %v315_v11  ;;  %v290_v31 = vpack.c.bf16 %v199_v29, %v192_v28  ;;  %v297_v37 = vpack.c.bf16 %v213_v35, %v206_v34  ;;  %v615_v11 = vmov 0   ;;  %v201_v34 = vld [vmem:[%s1108_s5 + $0x140] sm:$0xff]  ;;  %v235_v1 = vld [vmem:[%s1108_s5 + $0x250] sm:$0xff]  ;;  %v250_v6 = vld [vmem:[%s1108_s5 + $0x2c8] sm:$0xff] }
  0x24   :  { %380 = vmatprep.subr.bf16.mxu0 %v323_v62  ;;  %398 = vmatprep.mubr.bf16.mxu0 %v615_v11  ;;  %v292_v38 = vpack.c.bf16 %v201_v34, %v194_v33 }
  0x27   :  { %381 = vmatpush1.bf16.msra.mxu0 %v322_v4  ;;  %v237_v4 = vld [vmem:[%s1108_s5 + $0x260] sm:$0xff] }
  0x28   :  { %448 = vmatprep.subr.bf16.mxu0 %v278_v10  ;;  %v314_v9 = vpack.c.bf16 %v244_v5, %v237_v4  ;;  %v249_v10 = vld [vmem:[%s1108_s5 + $0x2c0] sm:$0xff] }
  0xdb   :  { %v80_v13 = vpop.f32.mrb[0].mxu0 }
  0xdc   :  { %v81_v14 = vadd.f32 %v541_v12, %v80_v13  ;;  %v568_v15 = vpop.f32.mrb[1].mxu0  ;;  %v543_v12 = vld [vmem:[%s1110_s4] ss:$0 sm:$0xff] }
  0xdd   :  { %v83_v18 = vpop.f32.mrb[2].mxu0 }
  0xde   :  { %v86_v21 = vmax.f32 %v81_v14, 0.0  ;;  %v569_v22 = vpop.f32.mrb[3].mxu0  ;;  %v165_v14 = vld [vmem:[%s1108_s5 + $0x20] sm:$0xff]  ;;  %v167_v18 = vld [vmem:[%s1108_s5 + $0x30] sm:$0xff] }
  0xdf   :  { %v187_v22 = vld [vmem:[%s1108_s5 + $0xd0] sm:$0xff]  ;;  %v279_v26 = vpack.c.bf16 %v174_v19, %v167_v18 }
  0xe0   :  { %v87_v24 = vpack.c.bf16 %v86_v21, %v86_v21  ;;  %v180_v21 = vld [vmem:[%s1108_s5 + $0x98] sm:$0xff]  ;;  %v263_v19 = vld [vmem:[%s1108_s5 + $0x330] sm:$0xff] }
  0xe1   :  { %v285_v29 = vpack.c.bf16 %v187_v22, %v180_v21  ;;  %v270_v21 = vld [vmem:[%s1108_s5 + $0x368] sm:$0xff]  ;;  %v265_v22 = vld [vmem:[%s1108_s5 + $0x340] sm:$0xff] }
  0xe2   :  { %587 = vmatmul.mubr.bf16.vlgmr.msra.gmra.mrb[0].mxu1 %v87_v24 }
  0xe3   :  { %408 = vmatpush1.bf16.msra.mxu1 %v275_v23  ;;  %439 = vmatprep.mubr.bf16.mxu1 %v615_v11 }
  0xe4   :  { %409 = vmatprep.subr.bf16.mxu1 %v283_v25  ;;  %v277_v25 = vpack.c.bf16 %v172_v17, %v165_v14  ;;  %v258_v14 = vld [vmem:[%s1108_s5 + $0x308] sm:$0xff] }
  0xe7   :  { %410 = vmatpush1.bf16.msra.mxu1 %v282_v30  ;;  %v186_v30 = vld [vmem:[%s1108_s5 + $0xc8] sm:$0xff] }
  0xe8   :  { %411 = vmatprep.subr.bf16.mxu1 %v290_v31  ;;  %v181_v31 = vld [vmem:[%s1108_s5 + $0xa0] sm:$0xff]  ;;  %v284_v35 = vpack.c.bf16 %v186_v30, %v179_v27 }
  0xeb   :  { %412 = vmatpush1.bf16.msra.mxu1 %v289_v36  ;;  %v286_v36 = vpack.c.bf16 %v188_v32, %v181_v31  ;;  %v329_v31 = vld [vmem:[%s1111_s6] sm:$0x7f] }
  0xec   :  { %413 = vmatprep.subr.bf16.mxu1 %v297_v37  ;;  %v193_v37 = vld [vmem:[%s1108_s5 + $0x100] sm:$0xff] }
  0xed   :  { %v291_v44 = vpack.c.bf16 %v200_v39, %v193_v37 }
  0xef   :  { %414 = vmatpush1.bf16.msra.mxu1 %v296_v42  ;;  %v208_v42 = vld [vmem:[%s1108_s5 + $0x178] sm:$0xff] }
  0xf0   :  { %415 = vmatprep.subr.bf16.mxu1 %v304_v43  ;;  %v215_v43 = vld [vmem:[%s1108_s5 + $0x1b0] sm:$0xff] }
  0xf1   :  { %v299_v47 = vpack.c.bf16 %v215_v43, %v208_v42 }
  0xf3   :  { %416 = vmatpush1.bf16.msra.mxu1 %v303_v48  ;;  %v214_v48 = vld [vmem:[%s1108_s5 + $0x1a8] sm:$0xff] }
  0xf4   :  { %417 = vmatprep.subr.bf16.mxu1 %v311_v49  ;;  %v209_v49 = vld [vmem:[%s1108_s5 + $0x180] sm:$0xff]  ;;  %v298_v53 = vpack.c.bf16 %v214_v48, %v207_v46 }
  0xf7   :  { %418 = vmatpush1.bf16.msra.mxu1 %v310_v54  ;;  %v300_v54 = vpack.c.bf16 %v216_v50, %v209_v49 }
  0xf8   :  { %419 = vmatprep.subr.bf16.mxu1 %v318_v55  ;;  %v221_v55 = vld [vmem:[%s1108_s5 + $0x1e0] sm:$0xff] }
  0xf9   :  { %v305_v62 = vpack.c.bf16 %v228_v57, %v221_v55 }
  0xfb   :  { %420 = vmatpush1.bf16.msra.mxu1 %v317_v58  ;;  %v223_v58 = vld [vmem:[%s1108_s5 + $0x1f0] sm:$0xff] }
  0xfc   :  { %421 = vmatprep.subr.bf16.mxu1 %v325_v3  ;;  %v307_v63 = vpack.c.bf16 %v230_v59, %v223_v58  ;;  %v242_v3 = vld [vmem:[%s1108_s5 + $0x288] sm:$0xff] }
  0xfd   :  { %v312_v8 = vpack.c.bf16 %v242_v3, %v235_v1 }
  0xff   :  { %422 = vmatpush1.bf16.msra.mxu1 %v324_v7  ;;  %v257_v7 = vld [vmem:[%s1108_s5 + $0x300] sm:$0xff] }
 0x100   :  { %590 = vmatprep.subr.bf16.mxu1 %v613_v0 }
 0x1b5   :  { %v153_v13 = vpop.f32.mrb[0].mxu1 }
 0x1b6   :  { %v154_v15 = vadd.f32 %v543_v12, %v153_v13  ;;  %v588_v16 = vpop.f32.mrb[1].mxu1  ;;  %v256_v12 = vld [vmem:[%s1108_s5 + $0x2f8] sm:$0xff]  ;;  %v251_v13 = vld [vmem:[%s1108_s5 + $0x2d0] sm:$0xff] }
 0x1b7   :  { %v156_v20 = vpop.f32.mrb[2].mxu1  ;;  %v271_v16 = vld [vmem:[%s1108_s5 + $0x370] sm:$0xff]  ;;  %v319_v17 = vpack.c.bf16 %v256_v12, %v249_v10  ;;  %v321_v18 = vpack.c.bf16 %v258_v14, %v251_v13 }
 0x1b8   :  { %v159_v23 = vmax.f32 %v154_v15, 0.0  ;;  %v589_v24 = vpop.f32.mrb[3].mxu1  ;;  %v264_v15 = vld [vmem:[%s1108_s5 + $0x338] sm:$0xff] }
 0x1b9   :  { %v327_v20 = vpack.c.bf16 %v271_v16, %v264_v15  ;;  %v326_v24 = vpack.c.bf16 %v270_v21, %v263_v19 }
 0x1ba   :  { %v949_v28 = vpack.c.bf16 %v159_v23, %v159_v23  ;;  %v272_v23 = vld [vmem:[%s1108_s5 + $0x378] sm:$0xff] }
 0x1bc   :  { %399 = vmatmul.mubr.bf16.vlgmr.msra.gmra.mrb[4].mxu0 %v949_v28  ;;  %440 = vmatmul.mubr.bf16.vlgmr.msra.gmra.mrb[4].mxu1 %v949_v28 }
 0x1bd   :  { %449 = vmatpush1.bf16.msra.mxu0 %v277_v25  ;;  %591 = vmatpush3.bf16.msra.mxu1 %v279_v26  ;;  %v328_v25 = vpack.c.bf16 %v272_v23, %v265_v22  ;;  %v331_v26 = vlaneseq }
 0x1be   :  { %450 = vmatprep.subr.bf16.mxu0 %v285_v29  ;;  %592 = vmatprep.subr.bf16.mxu1 %v613_v0 }
 0x1bf   :  { %480 = vmatprep.mubr.bf16.mxu0 %v615_v11  ;;  %606 = vmatprep.mubr.msk.bf16.mxu1 %vm614_vm1, %v613_v0  ;;  %v320_v11 = vpack.c.bf16 %v257_v7, %v250_v6  ;;  %v332_v27 = vshrl.u32 %v331_v26, 7 }
 0x1c1   :  { %451 = vmatpush1.bf16.msra.mxu0 %v284_v35  ;;  %593 = vmatpush3.bf16.msra.mxu1 %v286_v36  ;;  %v333_v29 = vsub.s32 0, %v332_v27  ;;  %v341_v30 = vsub.s32 2, %v332_v27  ;;  %v337_v32 = vsub.s32 1, %v332_v27  ;;  %v345_v33 = vsub.s32 3, %v332_v27 }
 0x1c2   :  { %452 = vmatprep.subr.bf16.mxu0 %v292_v38  ;;  %594 = vmatprep.subr.bf16.mxu1 %v613_v0  ;;  %v349_v48 = vsub.s32 4, %v332_v27  ;;  %v357_v49 = vsub.s32 6, %v332_v27  ;;  %v353_v50 = vsub.s32 5, %v332_v27 }
 0x1c3   :  { %v334_v34 = vrot.slane %v329_v31, %v333_v29  ;;  %v342_v35 = vrot.slane %v329_v31, %v341_v30  ;;  %v338_v36 = vrot.slane %v329_v31, %v337_v32 }
 0x1c4   :  { %v350_v51 = vrot.slane %v329_v31, %v349_v48  ;;  %v358_v52 = vrot.slane %v329_v31, %v357_v49 }
 0x1c5   :  { %453 = vmatpush1.bf16.msra.mxu0 %v291_v44  ;;  %595 = vmatpush3.bf16.msra.mxu1 %v293_v45 }
 0x1c6   :  { %454 = vmatprep.subr.bf16.mxu0 %v299_v47  ;;  %596 = vmatprep.subr.bf16.mxu1 %v613_v0 }
 0x1c9   :  { %455 = vmatpush1.bf16.msra.mxu0 %v298_v53  ;;  %597 = vmatpush3.bf16.msra.mxu1 %v300_v54  ;;  %v354_v53 = vrot.slane %v329_v31, %v353_v50 }
 0x1ca   :  { %456 = vmatprep.subr.bf16.mxu0 %v306_v56  ;;  %598 = vmatprep.subr.bf16.mxu1 %v613_v0 }
 0x1cd   :  { %457 = vmatpush1.bf16.msra.mxu0 %v305_v62  ;;  %599 = vmatpush3.bf16.msra.mxu1 %v307_v63 }
 0x1ce   :  { %458 = vmatprep.subr.bf16.mxu0 %v313_v2  ;;  %600 = vmatprep.subr.bf16.mxu1 %v613_v0 }
 0x1d1   :  { %459 = vmatpush1.bf16.msra.mxu0 %v312_v8  ;;  %601 = vmatpush3.bf16.msra.mxu1 %v314_v9 }
 0x1d2   :  { %460 = vmatprep.subr.bf16.mxu0 %v320_v11  ;;  %602 = vmatprep.subr.bf16.mxu1 %v613_v0 }
 0x1d5   :  { %461 = vmatpush1.bf16.msra.mxu0 %v319_v17  ;;  %603 = vmatpush3.bf16.msra.mxu1 %v321_v18 }
 0x1d6   :  { %462 = vmatprep.subr.bf16.mxu0 %v327_v20  ;;  %604 = vmatprep.subr.bf16.mxu1 %v613_v0  ;;  %v346_v0 = vrot.slane %v329_v31, %v345_v33 }
 0x1d9   :  { %463 = vmatpush1.bf16.msra.mxu0 %v326_v24  ;;  %605 = vmatpush3.bf16.msra.mxu1 %v328_v25 }
 0x1dc   :  { %481 = vmatmul.mubr.bf16.vlgmr.msra.gmra.mrb[8].mxu0 %v949_v28  ;;  %607 = vmatmul.mubr.bf16.vlgmr.msra.gmra.mrb[8].mxu1 %v949_v28 }
 0x28f   :  { %v400_v37 = vpop.f32.mrb[4].mxu0  ;;  %v441_v38 = vpop.f32.mrb[4].mxu1 }
 0x290   :  { %v401_v39 = vadd.f32 %v400_v37, %v334_v34  ;;  %v442_v40 = vadd.f32 %v441_v38, %v342_v35  ;;  %v402_v41 = vpop.f32.mrb[5].mxu0  ;;  %v443_v28 = vpop.f32.mrb[5].mxu1 }
 0x291   :  { %v403_v42 = vadd.f32 %v402_v41, %v338_v36  ;;  %v444_v43 = vadd.f32 %v443_v28, %v346_v0  ;;  %v404_v44 = vpop.f32.mrb[6].mxu0  ;;  %v445_v45 = vpop.f32.mrb[6].mxu1 }
 0x292   :  { %529 = vst [vmem:[%s1112_s7] sm:$0xff] %v401_v39  ;;  %531 = vst [vmem:[%s1112_s7 + $0x10] sm:$0xff] %v442_v40  ;;  %v405_v46 = vpop.f32.mrb[7].mxu0  ;;  %v446_v47 = vpop.f32.mrb[7].mxu1 }
 0x293   :  { %530 = vst [vmem:[%s1112_s7 + $0x8] sm:$0xff] %v403_v42  ;;  %532 = vst [vmem:[%s1112_s7 + $0x18] sm:$0xff] %v444_v43 }
 0x2af   :  { %v482_v54 = vpop.f32.mrb[8].mxu0  ;;  %v523_v55 = vpop.f32.mrb[8].mxu1 }
 0x2b0   :  { %v483_v56 = vadd.f32 %v482_v54, %v350_v51  ;;  %v524_v57 = vadd.f32 %v523_v55, %v358_v52  ;;  %v484_v58 = vpop.f32.mrb[9].mxu0  ;;  %v608_v59 = vpop.f32.mrb[9].mxu1 }
 0x2b1   :  { %v485_v60 = vadd.f32 %v484_v58, %v354_v53  ;;  %v486_v61 = vpop.f32.mrb[10].mxu0  ;;  %v526_v62 = vpop.f32.mrb[10].mxu1 }
 0x2b2   :  { %533 = vst [vmem:[%s1112_s7 + $0x20] sm:$0xff] %v483_v56  ;;  %536 = vst.msk [vmem:[%s1112_s7 + $0x30] sm:$0xff] %vm535_vm3, %v524_v57  ;;  %v487_v63 = vpop.f32.mrb[11].mxu0  ;;  %v609_v1 = vpop.f32.mrb[11].mxu1 }
 0x2b3   :  { %534 = vst [vmem:[%s1112_s7 + $0x28] sm:$0xff] %v485_v60 }

</bundles_post_ra>
